<compile_context>
chip_gen: v6e
topology: v6e:2x2x1
jax: 0.10.0
libtpu: 0.0.40
codegen_flags: <defaults>
</compile_context>

<pallas_src>
import numpy as np
import jax
import jax.numpy as jnp
from jax.experimental import pallas as pl
from jax.experimental.pallas import tpu as pltpu

LANES = 128            # vreg lane width: last tile dim
SUBLANES = 8           # f32 sublane granularity: second-to-last tile dim
MAX_BLOCK_ROWS = 1024  # (1024, 128) f32 block = 512 KiB per buffer


def _star_relu_kernel(sb_ref, x_ref, o_ref):
    # StarReLU: s * relu(x)^2 + b  (elementwise, VPU-only, mem-bound).
    s = sb_ref[0]                            # SMEM scalars -> scalar VPU operands
    b = sb_ref[1]
    x = x_ref[...].astype(jnp.float32)
    r = jnp.maximum(x, 0.0)
    o_ref[...] = (s * (r * r) + b).astype(o_ref.dtype)


def star_relu(x, scale, bias):
    """StarReLU forward: scale * relu(x)**2 + bias, for any input shape."""
    orig_shape = x.shape
    orig_dtype = x.dtype
    total = int(np.prod(orig_shape))

    # Lane-dense 2D view: flatten, pad to a whole number of (block_rows, 128)
    # tiles, iterate row blocks.  Padding is sliced off after the call.
    rows = pl.cdiv(total, LANES)
    block_rows = min(MAX_BLOCK_ROWS, pl.cdiv(rows, SUBLANES) * SUBLANES)
    padded_rows = pl.cdiv(rows, block_rows) * block_rows
    pad = padded_rows * LANES - total

    flat = x.reshape(-1)
    if pad:
        flat = jnp.pad(flat, (0, pad))
    x2 = flat.reshape(padded_rows, LANES)

    # Pack the two learnable scalars into one tiny SMEM-resident input.
    sb = jnp.stack([jnp.asarray(scale, jnp.float32).reshape(()),
                    jnp.asarray(bias, jnp.float32).reshape(())])          # (2,)

    grid = (padded_rows // block_rows,)
    out = pl.pallas_call(
        _star_relu_kernel,
        out_shape=jax.ShapeDtypeStruct((padded_rows, LANES), orig_dtype),
        grid=grid,
        in_specs=[
            pl.BlockSpec(memory_space=pltpu.MemorySpace.SMEM),   # scale/bias (2,)
            pl.BlockSpec((block_rows, LANES), lambda i: (i, 0)),  # x tile
        ],
        out_specs=pl.BlockSpec((block_rows, LANES), lambda i: (i, 0)),
        compiler_params=pltpu.CompilerParams(
            # Independent row blocks: shard across v7x's two TensorCores;
            # plain sequential (and still correct) on single-TC v5e/v6e.
            dimension_semantics=("parallel",),
        ),
    )(sb, x2)

    out = out.reshape(-1)
    if pad:
        out = out[:total]
    return out.reshape(orig_shape)


if __name__ == "__main__":
    key = jax.random.PRNGKey(0)
    kx, = jax.random.split(key, 1)

    # Small NCHW activation, as StarReLU sees inside a MetaFormer block.
    x = jax.random.normal(kx, (2, 4, 16, 16), jnp.float32)
    # Module defaults are scale=1.0, bias=0.0 (learnable); use deterministic
    # non-trivial values so both parameters are exercised numerically.
    scale = jnp.float32(0.8944)
    bias = jnp.float32(-0.0625)

    out = star_relu(x, scale, bias)
    jax.block_until_ready(out)

    ref = scale * jnp.square(jnp.maximum(x, 0.0)) + bias
    np.testing.assert_allclose(np.asarray(out), np.asarray(ref),
                               rtol=1e-6, atol=1e-6)
    print("KERNEL_OK")
</pallas_src>

<mosaic_0001>
module attributes {stable_mosaic.version = 11 : i64} {
  func.func @_star_relu_kernel(%arg0: i32, %arg1: memref<2xf32, #tpu.memory_space<smem>>, %arg2: memref<16x128xf32, #tpu.memory_space<vmem>>, %arg3: memref<16x128xf32, #tpu.memory_space<vmem>>) attributes {dimension_semantics = [#tpu.dimension_semantics<parallel>], iteration_bounds = array<i64: 1>, scalar_prefetch = 0 : i64, scratch_operands = 0 : i64, tpu.core_type = #tpu.core_type<tc>, window_params = [{transform_indices = @transform_0, window_bounds = array<i64: 2>}, {transform_indices = @transform_1, window_bounds = array<i64: 16, 128>}, {transform_indices = @transform_2, window_bounds = array<i64: 16, 128>}]} {
    %c0 = arith.constant 0 : index
    %0 = memref.load %arg1[%c0] : memref<2xf32, #tpu.memory_space<smem>>
    %c1 = arith.constant 1 : index
    %1 = memref.load %arg1[%c1] : memref<2xf32, #tpu.memory_space<smem>>
    %c0_0 = arith.constant 0 : index
    %c0_1 = arith.constant 0 : index
    %2 = vector.load %arg2[%c0_0, %c0_1] : memref<16x128xf32, #tpu.memory_space<vmem>>, vector<16x128xf32>
    %cst = arith.constant 0.000000e+00 : f32
    %3 = vector.broadcast %cst : f32 to vector<16x128xf32>
    %4 = arith.maximumf %2, %3 : vector<16x128xf32>
    %5 = arith.mulf %4, %4 : vector<16x128xf32>
    %6 = vector.broadcast %0 : f32 to vector<16x128xf32>
    %7 = arith.mulf %6, %5 : vector<16x128xf32>
    %8 = vector.broadcast %1 : f32 to vector<16x128xf32>
    %9 = arith.addf %7, %8 : vector<16x128xf32>
    %c0_2 = arith.constant 0 : index
    %c0_3 = arith.constant 0 : index
    %10 = vector.load %arg3[%c0_2, %c0_3] : memref<16x128xf32, #tpu.memory_space<vmem>>, vector<16x128xf32>
    tpu.vector_store %arg3[%c0_2, %c0_3], %9 {strides = array<i32>} : memref<16x128xf32, #tpu.memory_space<vmem>>, vector<16x128xf32>,
    return
  }
  func.func @transform_0(%arg0: i32) -> i32 {
    %c0_i32 = arith.constant 0 : i32
    %c0_i32_0 = arith.constant 0 : i32
    return %c0_i32 : i32
  }
  func.func @transform_1(%arg0: i32) -> (i32, i32) {
    %c0_i32 = arith.constant 0 : i32
    %c0_i32_0 = arith.constant 0 : i32
    return %arg0, %c0_i32 : i32, i32
  }
  func.func @transform_2(%arg0: i32) -> (i32, i32) {
    %c0_i32 = arith.constant 0 : i32
    %c0_i32_0 = arith.constant 0 : i32
    return %arg0, %c0_i32 : i32, i32
  }
}

</mosaic_0001>

<bundles_post_ra>
// kernel: tpu_custom_call.1
= control target key start
LH: loop header
LB: loop body
LE: loop exit
PB: predicated region body
PF: predicated region fallthrough
CT: control target
= control target key end

     0   :  { %7 = vsyncpa [#allocation5], 0  ;;  %s166_s0 = inlined_call_operand.hbm [shape: f32[2], index: 0, kind: input, shape index: {}]   ;;  %s167_s1 = inlined_call_operand.hbm [shape: f32[16,128], index: 1, kind: input, shape index: {}]   ;;  %s168_s2 = inlined_call_operand.hbm [shape: f32[16,128], index: 2, kind: output, shape index: {}]  }
   0x1   :  { %8 = vsyncpa [#allocation3], 0 }
   0x2   :  { %9 = vsyncpa [#allocation4], 0  ;;  %s131_s9 = smov [#allocation2]   ;;  %s132_s12 = smov [#allocation6]  }
   0x3   :  { %17 = dma.hbm_to_smem %s166_s0, 16, %s131_s9, [#allocation5]  }
   0x4   :  { %s23_s13 = sshll.u32 %s132_s12, 4  ;;  %s24_s13 = int_to_ptr.vmem [resolvable:$true] %s23_s13 }
   0x5   :  { %s93_s14 = scalar_lea.vmem %s24_s13, 256  ;;  %p98_p1 = scmp.lt.s32.totalorder %s24_s13, %s24_s13 }
   0x6   :  { %p94_p0 = scmp.ne.s32.totalorder %s24_s13, %s93_s14  ;;  %p99_p2 = scmp.lt.s32.totalorder %s93_s14, %s93_s14 }
   0x8   :  { %p100_p3 = por %p99_p2, %p98_p1 }
   0xa   :  { %p101_p4 = pnand %p100_p3, %p94_p0 }
   0xc   :  { %104 = shalt.err (!%p101_p4)
}
   0xd   :  { %s133_s15 = smov 128   ;;  %s134_s16 = smov 8  }
   0xe   :  { %29 = dma.hbm_to_vmem [thread:$0]  %s167_s1, 256, %s24_s13, [#allocation3], %s133_s15, %s133_s15, %s134_s16  }
   0xf   :  { %125 = dma.done.wait [#allocation5], 16  }
  0x10   :  { %126 = vsyncadd [#allocation5], 4294967280 }
  0x11   :  { %127 = dma.done.wait [#allocation3], 256  }
  0x12   :  { %128 = vsyncadd [#allocation3], 4294967040 }
  0x13   :  { %36 = sfence }
  0x14   :  { %s37_s0 = sld [smem:[#allocation2]]  ;;  %v39_v0 = vld [vmem:[#allocation6] sm:$0xff]  ;;  %v40_v1 = vld [vmem:[#allocation6 + $0x8] sm:$0xff]  ;;  %s135_s20 = smov [#allocation7]  }
  0x15   :  { %s71_s19 = sld [smem:[#allocation2 + $0x1]]  ;;  %v41_v2 = vmax.f32 %v39_v0, 0.0  ;;  %v42_v3 = vmax.f32 %v40_v1, 0.0  ;;  %s58_s21 = sshll.u32 %s135_s20, 4  ;;  %s59_s21 = int_to_ptr.vmem [resolvable:$true] %s58_s21 }
  0x16   :  { %s105_s1 = scalar_lea.vmem %s59_s21, 256  ;;  %p110_p6 = scmp.lt.s32.totalorder %s59_s21, %s59_s21 }
  0x17   :  { %v43_v4 = vmul.f32 %v41_v2, %v41_v2  ;;  %v44_v5 = vmul.f32 %v42_v3, %v42_v3  ;;  %p106_p5 = scmp.ne.s32.totalorder %s59_s21, %s105_s1  ;;  %p111_p7 = scmp.lt.s32.totalorder %s105_s1, %s105_s1 }
  0x19   :  { %p112_p8 = por %p111_p7, %p110_p6 }
  0x1a   :  { %v45_v6 = vstv %s37_s0 }
  0x1b   :  { %v46_v7 = vmul.f32 %v45_v6, %v43_v4  ;;  %v48_v8 = vstv %s71_s19  ;;  %v47_v9 = vmul.f32 %v45_v6, %v44_v5  ;;  %p113_p9 = pnand %p112_p8, %p106_p5 }
  0x1d   :  { %v49_v10 = vadd.f32 %v48_v8, %v46_v7  ;;  %v50_v11 = vadd.f32 %v48_v8, %v47_v9 }
  0x1f   :  { %51 = vst [vmem:[#allocation7] sm:$0xff] %v49_v10  ;;  %52 = vst [vmem:[#allocation7 + $0x8] sm:$0xff] %v50_v11 }
  0x20   :  { %116 = shalt.err (!%p113_p9)
}
  0x21   :  { %64 = dma.vmem_to_hbm [thread:$0]  %s59_s21, 256, %s168_s2, [#allocation4], %s133_s15, %s133_s15, %s134_s16  }
  0x22   :  { %129 = dma.done.wait [#allocation4], 256  }
  0x23   :  { %130 = vsyncadd [#allocation4], 4294967040 }
  0x24   :  { %68 = vsyncpa [#allocation3], 1 }
  0x25   :  { %69 = vsyncpa [#allocation4], 1 }
  0x26   :  { %70 = vsyncpa [#allocation5], 1 }

</bundles_post_ra>
